<compile_context>
chip_gen: v6e
topology: v6e:2x2x1
jax: 0.10.0
libtpu: 0.0.40
codegen_flags: <defaults>
</compile_context>

<pallas_src>
import functools
from dataclasses import dataclass
from typing import Optional

import jax
import jax.numpy as jnp
from jax.experimental import pallas as pl
from jax.experimental.pallas import tpu as pltpu


@dataclass
class NoiseSchedulerConfig:
    timesteps: int = 1000
    beta_start: float = 0.0015
    beta_end: float = 0.0195


def make_schedule_buffers(config: NoiseSchedulerConfig):
    """Deterministic schedule buffers (same math as the PyTorch __init__)."""
    betas = jnp.linspace(config.beta_start ** 0.5, config.beta_end ** 0.5,
                         config.timesteps, dtype=jnp.float32) ** 2
    alphas = 1.0 - betas
    alpha_cumprod = jnp.cumprod(alphas, axis=0)
    return dict(
        betas=betas,
        alphas=alphas,
        alpha_cumprod=alpha_cumprod,
        sqrt_alpha_cumprod=jnp.sqrt(alpha_cumprod),
        sqrt_one_minus_alpha_cumprod=jnp.sqrt(1.0 - alpha_cumprod),
    )


# ----------------------------------------------------------------------------
# Layout / tiling plan
# ----------------------------------------------------------------------------
def _plan(B: int, n_elems: int, itemsize: int = 4,
          target_block_bytes: int = 2 << 20):
    """Return (n_pad, M, L, b_tile, m_tile).

    Each batch item is flattened to n_pad = M * L elements (L a multiple of
    128 lanes).  Blocks are (b_tile, m_tile, L) with m_tile a multiple of 8
    (or the full M), sized to ~target_block_bytes per array.  b_tile and
    m_tile always divide B and M respectively (no ragged blocks).
    """
    # Lane width: largest of {1024,512,256,128} dividing n_elems, else pad
    # up to a multiple of 128.
    L = 128
    for cand in (1024, 512, 256):
        if n_elems % cand == 0:
            L = cand
            break
    n_pad = ((n_elems + L - 1) // L) * L
    M = n_pad // L

    # If the per-item row count is large but not sublane aligned, pad a few
    # extra rows (cheap) so the M axis can be tiled with 8-row multiples.
    if M % 8 != 0 and M * L * itemsize > target_block_bytes:
        M = ((M + 7) // 8) * 8
        n_pad = M * L

    # Rows per block.
    if M % 8 == 0:
        target_rows = max(8, (target_block_bytes // (L * itemsize) // 8) * 8)
        m_tile = min(M, target_rows)
        while M % m_tile:
            m_tile -= 8
    else:
        m_tile = M  # full-dim exception to the (8,...) rule; only small M here.

    # Batch items per block: merge batches when one item doesn't fill the
    # budget (only possible when the whole item fits in one block).
    b_tile = 1
    if m_tile == M:
        max_b = max(1, target_block_bytes // max(1, M * L * itemsize))
        for d in range(min(B, max_b), 0, -1):
            if B % d == 0:
                b_tile = d
                break

    # v7x: keep >= 2 grid steps along a parallel axis so both TensorCores
    # get work (when the batch allows it).
    if (B // b_tile) * (M // m_tile) < 2 and b_tile > 1:
        for d in range(b_tile - 1, 0, -1):
            if B % d == 0:
                b_tile = d
                break
    return n_pad, M, L, b_tile, m_tile


# ----------------------------------------------------------------------------
# Kernels
# ----------------------------------------------------------------------------
def _fma_kernel(sa_ref, sb_ref, img_ref, noise_ref, out_ref):
    """noised = sa * image + sb * noise  (noise supplied by caller).

    sa_ref/sb_ref: VMEM f32[b_tile, 1, 1]   broadcast over the block
    img/noise/out: VMEM     [b_tile, m_tile, L]
    """
    x = img_ref[...].astype(jnp.float32)
    n = noise_ref[...].astype(jnp.float32)
    out_ref[...] = (sa_ref[...] * x + sb_ref[...] * n).astype(out_ref.dtype)


def _fma_rng_kernel(seed_ref, sa_ref, sb_ref, img_ref, noise_ref, out_ref):
    """Same FMA, but the Gaussian noise is generated in-kernel and emitted.

    seed_ref: SMEM int32[1]  base seed; each grid step reseeds with a unique
              offset so blocks are independent and core-assignment invariant.
    """
    step = pl.program_id(0) * pl.num_programs(1) + pl.program_id(1)
    pltpu.prng_seed(seed_ref[0] + step)
    z = pltpu.stateful_normal(img_ref.shape, jnp.float32)
    x = img_ref[...].astype(jnp.float32)
    noise_ref[...] = z.astype(noise_ref.dtype)
    out_ref[...] = (sa_ref[...] * x + sb_ref[...] * z).astype(out_ref.dtype)


_COMPILER_PARAMS = pltpu.CompilerParams(
    dimension_semantics=("parallel", "parallel"),
    vmem_limit_bytes=32 * 1024 * 1024,
)


@functools.partial(jax.jit, static_argnames=("b_tile", "m_tile"))
def _noising_call(sa3, sb3, image_3d, noise_3d, *, b_tile, m_tile):
    B, M, L = image_3d.shape
    blk = pl.BlockSpec((b_tile, m_tile, L), lambda b, s: (b, s, 0))
    scl = pl.BlockSpec((b_tile, 1, 1), lambda b, s: (b, 0, 0))
    return pl.pallas_call(
        _fma_kernel,
        out_shape=jax.ShapeDtypeStruct((B, M, L), image_3d.dtype),
        grid=(B // b_tile, M // m_tile),
        in_specs=[scl, scl, blk, blk],
        out_specs=blk,
        compiler_params=_COMPILER_PARAMS,
    )(sa3, sb3, image_3d, noise_3d)


@functools.partial(jax.jit, static_argnames=("b_tile", "m_tile"))
def _noising_rng_call(seed, sa3, sb3, image_3d, *, b_tile, m_tile):
    B, M, L = image_3d.shape
    blk = pl.BlockSpec((b_tile, m_tile, L), lambda b, s: (b, s, 0))
    scl = pl.BlockSpec((b_tile, 1, 1), lambda b, s: (b, 0, 0))
    return pl.pallas_call(
        _fma_rng_kernel,
        out_shape=(jax.ShapeDtypeStruct((B, M, L), image_3d.dtype),   # noise
                   jax.ShapeDtypeStruct((B, M, L), image_3d.dtype)),  # noised
        grid=(B // b_tile, M // m_tile),
        in_specs=[pl.BlockSpec(memory_space=pltpu.MemorySpace.SMEM),  # seed[1]
                  scl, scl, blk],
        out_specs=(blk, blk),
        compiler_params=_COMPILER_PARAMS,
    )(seed, sa3, sb3, image_3d)


# ----------------------------------------------------------------------------
# Module
# ----------------------------------------------------------------------------
class NoiseScheduler:
    """JAX/Pallas port of the PyTorch NoiseScheduler (forward pass)."""

    def __init__(self, config: NoiseSchedulerConfig) -> None:
        self.config = config
        bufs = make_schedule_buffers(config)
        self.betas = bufs["betas"]
        self.alphas = bufs["alphas"]
        self.alpha_cumprod = bufs["alpha_cumprod"]
        self.sqrt_alpha_cumprod = bufs["sqrt_alpha_cumprod"]
        self.sqrt_one_minus_alpha_cumprod = bufs["sqrt_one_minus_alpha_cumprod"]
        self._auto_rng_calls = 0
        self._use_inkernel_rng = (hasattr(pltpu, "prng_seed")
                                  and hasattr(pltpu, "stateful_normal"))

    def forward(self, image, t: Optional[jax.Array] = None,
                noise: Optional[jax.Array] = None, *, rng=None):
        batch_mode = True
        if image.ndim == 3:
            batch_mode = False
            image = image[None]
            if t is not None:
                t = jnp.atleast_1d(t)
            if noise is not None:
                noise = noise[None]
        B, C, H, W = image.shape

        # TODO(synk): the PyTorch ValueError range-check on t requires a
        # blocking host sync (t.min()/t.max()); out-of-range t instead follows
        # jnp.take's clamp semantics here.

        if rng is None:
            # Fresh randomness per call (PyTorch draws new randint/randn each
            # forward); deterministic given the call index.
            rng = jax.random.PRNGKey(self._auto_rng_calls)
            self._auto_rng_calls += 1
        rng_t, rng_n = jax.random.split(rng)

        if t is None:
            t = jax.random.randint(rng_t, (B,), 0, self.config.timesteps,
                                   dtype=jnp.int32)
        else:
            t = t.astype(jnp.int32)

        # Per-batch schedule gather in the wrapper (B-length, cheap) ->
        # f32[B,1,1] VMEM inputs broadcast inside the kernel.
        sa = jnp.take(self.sqrt_alpha_cumprod, t, axis=0) \
                .astype(jnp.float32).reshape(B, 1, 1)
        sb = jnp.take(self.sqrt_one_minus_alpha_cumprod, t, axis=0) \
                .astype(jnp.float32).reshape(B, 1, 1)

        n_elems = C * H * W
        n_pad, M, L, b_tile, m_tile = _plan(B, n_elems)

        def to_blocks(x):
            xf = x.reshape(B, n_elems)
            if n_pad != n_elems:
                # TODO(synk): unaligned tails still pay one pad + slice copy;
                # a masked last tile (pltpu.store with a lane mask) would
                # remove it.  The aligned path (n_elems % 128 == 0) is free.
                xf = jnp.pad(xf, ((0, 0), (0, n_pad - n_elems)))
            return xf.reshape(B, M, L)

        def from_blocks(x3):
            if n_pad != n_elems:
                return x3.reshape(B, n_pad)[:, :n_elems].reshape(B, C, H, W)
            return x3.reshape(B, C, H, W)

        image3 = to_blocks(image)

        noised = None
        if noise is None and self._use_inkernel_rng:
            # Generate the Gaussian noise in-kernel: one fewer full-image HBM
            # stream than materializing it with jax.random.normal first.
            # (Different RNG stream than jax.random.normal, still N(0,1).)
            seed = jax.random.randint(rng_n, (1,), 0, 2 ** 31 - 1,
                                      dtype=jnp.int32)
            try:
                noise3, noised3 = _noising_rng_call(
                    seed, sa, sb, image3, b_tile=b_tile, m_tile=m_tile)
                noise = from_blocks(noise3)
                noised = from_blocks(noised3)
            except Exception:
                # Stateful in-kernel RNG not supported on this jax build /
                # chip; fall back to the plain two-input kernel below.
                self._use_inkernel_rng = False

        if noised is None:
            if noise is None:
                noise = jax.random.normal(rng_n, image.shape, dtype=image.dtype)
            noise3 = to_blocks(noise)
            noised3 = _noising_call(sa, sb, image3, noise3,
                                    b_tile=b_tile, m_tile=m_tile)
            noised = from_blocks(noised3)

        if not batch_mode:
            noised = noised[0]
            noise = noise[0]
            t = t[0]
        return noised, noise, t

    # TODO(synk): `denoise` (reverse sampling step with a data-dependent
    # Python branch on t[0].item()) is not part of the forward pass and is
    # not implemented as a Pallas kernel here.


def _reference_forward(sched, image, t, noise):
    B = image.shape[0]
    sa = jnp.take(sched.sqrt_alpha_cumprod, t).reshape(B, 1, 1, 1)
    sb = jnp.take(sched.sqrt_one_minus_alpha_cumprod, t).reshape(B, 1, 1, 1)
    return sa * image + sb * noise


if __name__ == "__main__":
    config = NoiseSchedulerConfig()
    sched = NoiseScheduler(config)

    key = jax.random.PRNGKey(0)
    k_img, k_t, k_noise, k_img2, k_noise2, k_rng = jax.random.split(key, 6)

    # 1) Aligned case: 4*16*16 = 1024 elements per item; batch-merged blocks.
    B, C, H, W = 2, 4, 16, 16
    image = jax.random.normal(k_img, (B, C, H, W), dtype=jnp.float32)
    t = jax.random.randint(k_t, (B,), 0, config.timesteps, dtype=jnp.int32)
    noise = jax.random.normal(k_noise, (B, C, H, W), dtype=jnp.float32)

    noised, noise_out, t_out = sched.forward(image, t, noise)
    jax.block_until_ready(noised)
    ref = _reference_forward(sched, image, t, noise)
    assert noised.shape == (B, C, H, W)
    assert jnp.allclose(noised, ref, atol=1e-6, rtol=1e-6)
    assert jnp.array_equal(t_out, t)
    assert jnp.allclose(noise_out, noise)

    # 2) Unaligned case (exercises the pad path): 3*10*10 = 300 elements.
    B2, C2, H2, W2 = 2, 3, 10, 10
    image2 = jax.random.normal(k_img2, (B2, C2, H2, W2), dtype=jnp.float32)
    noise2 = jax.random.normal(k_noise2, (B2, C2, H2, W2), dtype=jnp.float32)
    t2 = jnp.array([0, config.timesteps - 1], dtype=jnp.int32)
    noised2, _, _ = sched.forward(image2, t2, noise2)
    jax.block_until_ready(noised2)
    ref2 = _reference_forward(sched, image2, t2, noise2)
    assert jnp.allclose(noised2, ref2, atol=1e-6, rtol=1e-6)

    # 3) noise=None path (in-kernel RNG when available): the returned noise
    #    must satisfy the FMA identity exactly, and look ~N(0,1).
    noised3, noise3, t3 = sched.forward(image, t, None, rng=k_rng)
    jax.block_until_ready(noised3)
    ref3 = _reference_forward(sched, image, t3, noise3)
    assert noised3.shape == (B, C, H, W) and noise3.shape == (B, C, H, W)
    assert jnp.allclose(noised3, ref3, atol=1e-5, rtol=1e-5)
    assert abs(float(jnp.mean(noise3))) < 0.2
    assert abs(float(jnp.std(noise3)) - 1.0) < 0.2

    # 4) Non-batched 3-D input path.
    n1, nz1, t1 = sched.forward(image[0], jnp.int32(7), noise[0])
    jax.block_until_ready(n1)
    ref1 = _reference_forward(sched, image[:1],
                              jnp.array([7], dtype=jnp.int32), noise[:1])[0]
    assert n1.shape == (C, H, W)
    assert jnp.allclose(n1, ref1, atol=1e-6, rtol=1e-6)

    print("KERNEL_OK")
</pallas_src>

<mosaic_0001>
module attributes {stable_mosaic.version = 11 : i64} {
  func.func @_fma_kernel(%arg0: i32, %arg1: i32, %arg2: memref<1x1x1xf32, #tpu.memory_space<vmem>>, %arg3: memref<1x1x1xf32, #tpu.memory_space<vmem>>, %arg4: memref<1x1x1024xf32, #tpu.memory_space<vmem>>, %arg5: memref<1x1x1024xf32, #tpu.memory_space<vmem>>, %arg6: memref<1x1x1024xf32, #tpu.memory_space<vmem>>) attributes {dimension_semantics = [#tpu.dimension_semantics<parallel>, #tpu.dimension_semantics<parallel>], iteration_bounds = array<i64: 2, 1>, scalar_prefetch = 0 : i64, scratch_operands = 0 : i64, tpu.core_type = #tpu.core_type<tc>, window_params = [{transform_indices = @transform_0, window_bounds = array<i64: 1, 1, 1>}, {transform_indices = @transform_1, window_bounds = array<i64: 1, 1, 1>}, {transform_indices = @transform_2, window_bounds = array<i64: 1, 1, 1024>}, {transform_indices = @transform_3, window_bounds = array<i64: 1, 1, 1024>}, {transform_indices = @transform_4, window_bounds = array<i64: 1, 1, 1024>}]} {
    %c0 = arith.constant 0 : index
    %c0_0 = arith.constant 0 : index
    %c0_1 = arith.constant 0 : index
    %0 = vector.load %arg4[%c0, %c0_0, %c0_1] : memref<1x1x1024xf32, #tpu.memory_space<vmem>>, vector<1x1x1024xf32>
    %c0_2 = arith.constant 0 : index
    %c0_3 = arith.constant 0 : index
    %c0_4 = arith.constant 0 : index
    %1 = vector.load %arg5[%c0_2, %c0_3, %c0_4] : memref<1x1x1024xf32, #tpu.memory_space<vmem>>, vector<1x1x1024xf32>
    %c0_5 = arith.constant 0 : index
    %c0_6 = arith.constant 0 : index
    %c0_7 = arith.constant 0 : index
    %2 = vector.load %arg2[%c0_5, %c0_6, %c0_7] : memref<1x1x1xf32, #tpu.memory_space<vmem>>, vector<1x1x1xf32>
    %3 = vector.broadcast %2 : vector<1x1x1xf32> to vector<1x1x1024xf32>
    %4 = arith.mulf %3, %0 : vector<1x1x1024xf32>
    %c0_8 = arith.constant 0 : index
    %c0_9 = arith.constant 0 : index
    %c0_10 = arith.constant 0 : index
    %5 = vector.load %arg3[%c0_8, %c0_9, %c0_10] : memref<1x1x1xf32, #tpu.memory_space<vmem>>, vector<1x1x1xf32>
    %6 = vector.broadcast %5 : vector<1x1x1xf32> to vector<1x1x1024xf32>
    %7 = arith.mulf %6, %1 : vector<1x1x1024xf32>
    %8 = arith.addf %4, %7 : vector<1x1x1024xf32>
    %c0_11 = arith.constant 0 : index
    %c0_12 = arith.constant 0 : index
    %c0_13 = arith.constant 0 : index
    %9 = vector.load %arg6[%c0_11, %c0_12, %c0_13] : memref<1x1x1024xf32, #tpu.memory_space<vmem>>, vector<1x1x1024xf32>
    tpu.vector_store %arg6[%c0_11, %c0_12, %c0_13], %8 {strides = array<i32>} : memref<1x1x1024xf32, #tpu.memory_space<vmem>>, vector<1x1x1024xf32>,
    return
  }
  func.func @transform_0(%arg0: i32, %arg1: i32) -> (i32, i32, i32) {
    %c0_i32 = arith.constant 0 : i32
    %c0_i32_0 = arith.constant 0 : i32
    %c0_i32_1 = arith.constant 0 : i32
    return %arg0, %c0_i32, %c0_i32_0 : i32, i32, i32
  }
  func.func @transform_1(%arg0: i32, %arg1: i32) -> (i32, i32, i32) {
    %c0_i32 = arith.constant 0 : i32
    %c0_i32_0 = arith.constant 0 : i32
    %c0_i32_1 = arith.constant 0 : i32
    return %arg0, %c0_i32, %c0_i32_0 : i32, i32, i32
  }
  func.func @transform_2(%arg0: i32, %arg1: i32) -> (i32, i32, i32) {
    %c0_i32 = arith.constant 0 : i32
    %c0_i32_0 = arith.constant 0 : i32
    return %arg0, %arg1, %c0_i32 : i32, i32, i32
  }
  func.func @transform_3(%arg0: i32, %arg1: i32) -> (i32, i32, i32) {
    %c0_i32 = arith.constant 0 : i32
    %c0_i32_0 = arith.constant 0 : i32
    return %arg0, %arg1, %c0_i32 : i32, i32, i32
  }
  func.func @transform_4(%arg0: i32, %arg1: i32) -> (i32, i32, i32) {
    %c0_i32 = arith.constant 0 : i32
    %c0_i32_0 = arith.constant 0 : i32
    return %arg0, %arg1, %c0_i32 : i32, i32, i32
  }
}

</mosaic_0001>

<bundles_post_ra>
// kernel: _noising_call.1
= control target key start
LH: loop header
LB: loop body
LE: loop exit
PB: predicated region body
PF: predicated region fallthrough
CT: control target
= control target key end

     0   :  { %9 = vsyncpa [#allocation3], 0  ;;  %s909_s0 = inlined_call_operand.vmem [shape: f32[2,1,1], index: 0, kind: input, shape index: {}]   ;;  %s910_s1 = inlined_call_operand.vmem [shape: f32[2,1,1], index: 1, kind: input, shape index: {}]   ;;  %s911_s2 = inlined_call_operand.hbm [shape: f32[2,1,1024], index: 2, kind: input, shape index: {}]   ;;  %s912_s3 = inlined_call_operand.hbm [shape: f32[2,1,1024], index: 3, kind: input, shape index: {}]   ;;  %s913_s4 = inlined_call_operand.hbm [shape: f32[2,1,1024], index: 4, kind: output, shape index: {}]  }
   0x1   :  { %11 = vsyncpa [#allocation3 + $0x1], 0 }
   0x2   :  { %12 = vsyncpa [#allocation6], 0 }
   0x3   :  { %14 = vsyncpa [#allocation6 + $0x1], 0 }
   0x4   :  { %15 = vsyncpa [#allocation4], 0 }
   0x5   :  { %17 = vsyncpa [#allocation4 + $0x1], 0  ;;  %s735_s15 = smov 0   ;;  %s737_s16 = smov 0  }
   0x6   :  { %s739_s17 = smov 0   ;;  %s741_s18 = smov 0  }
   0x7   :  { %s743_s19 = smov 0   ;;  %s745_s20 = smov 0  }
   0x8 LB: > { %s473_s21 = sadd.s32 4294967295, %s704_s20   ;;  %s474_s22 = sadd.s32 4294967294, %s704_s20   ;;  %s704_s20 = sphi %s745_s20, %s23_s20   ;;  %s700_s19 = sphi %s743_s19, %s925_s19   ;;  %s696_s18 = sphi %s741_s18, %s924_s18   ;;  %s692_s17 = sphi %s739_s17, %s923_s17   ;;  %s688_s16 = sphi %s737_s16, %s922_s16   ;;  %s684_s15 = sphi %s735_s15, %s921_s15  }
   0x9   : > { %s35_s23 = sadd.s32 1, %s700_s19  ;;  %s96_s24 = sadd.s32 1, %s692_s17 }
   0xa   : > { %p37_p0 = scmp.ge.s32.totalorder %s35_s23, 2  ;;  %p103_p1 = scmp.ne.s32.totalorder %s692_s17, %s688_s16 }
   0xb   : > { %p104_p2 = scmp.eq.s32.totalorder %s704_s20, 0  ;;  %p109_p3 = scmp.ne.s32.totalorder %s688_s16, %s684_s15 }
   0xc   : > { %s927_s23 = smov (%p37_p0, %s35_s23), 0  ;;  %p110_p5 = scmp.eq.s32.totalorder %s473_s21, 0 }
   0xd   : > { %p776_p4 = por %p104_p2, %p103_p1  ;;  %s91_s26 = ssub.s32 %s700_s19, %s927_s23 }
   0xe   : > { %p163_p6 = scmp.eq.s32.totalorder %s473_s21, 1  ;;  %p94_p7 = scmp.eq.s32.totalorder %s91_s26, 0 }
   0xf   : > { %p782_p8 = por %p110_p5, %p109_p3  ;;  %p169_p10 = scmp.eq.s32.totalorder %s474_s22, 1 }
  0x10   : > { %p786_p9 = por %p163_p6, %p103_p1  ;;  %p512_p13 = scmp.lt.s32.totalorder %s704_s20, 2 }
  0x11   : > { %s791_s29 = scalar_select %p94_p7, %s692_s17, %s96_s24  }
  0x12   : > { %p793_p11 = por %p169_p10, %p109_p3  ;;  %s800_s5 = sand.u32 1, %s692_s17  }
  0x13   : > { %s477_s6 = sshll.u32 %s800_s5, 3  ;;  %s492_s7 = sshll.u32 %s700_s19, 7 }
  0x14   : > { %s213_s10 = scalar_lea.hbm %s911_s2, %s492_s7  ;;  %s205_s11 = scalar_lea.vmem [#allocation2], %s477_s6 }
  0x15   : > { %s215_s12 = sshll.u32 %s205_s11, 4  ;;  %p809_p0 = pnand %p512_p13, %p776_p4  ;;  %s216_s12 = int_to_ptr.vmem [resolvable:$true] %s215_s12 }
  0x16   : > { %p483_p1 = scmp.ge.s32.totalorder %s704_s20, 1  ;;  %p241_p2 = scmp.lt.s32.totalorder %s704_s20, 3 }
  0x17   : > { %s202_s14 = scalar_lea.sflag [#allocation3], %s800_s5  ;;  %p566_p3 = pneg %p809_p0 }
  0x18   : > { %s577_s21 = scalar_lea.vmem %s216_s12, 128  ;;  %s706_s22 = smov [#allocation2]  }
  0x19   : > { %p578_p5 = scmp.ne.s32.totalorder %s216_s12, %s577_s21  ;;  %s582_s24 = sshll.u32 %s706_s22, 4  ;;  %s583_s24 = int_to_ptr.vmem [resolvable:$false] %s582_s24 }
  0x1a   : > { %s584_s25 = scalar_lea.vmem %s583_s24, 256  ;;  %p585_p4 = scmp.lt.s32.totalorder %s216_s12, %s583_s24 }
  0x1b   : > { %p580_p6 = pnand %p578_p5, %p566_p3  ;;  %p586_p10 = scmp.lt.s32.totalorder %s584_s25, %s577_s21 }
  0x1d   : > { %p581_p7 = pneg %p580_p6  ;;  %p587_p13 = por %p586_p10, %p585_p4 }
  0x1f   : > { %p588_p12 = pnand %p587_p13, %p581_p7 }
  0x21   : > { %591 = shalt.err (!%p588_p12)
}
  0x22   : > { %504 = dma.hbm_to_vmem [thread:$0]  (!%p809_p0), %s213_s10, 128, %s216_s12, %s202_s14  }
  0x23   : > { %p827_p5 = pnand %p483_p1, %p241_p2  ;;  %s234_s11 = scalar_lea.hbm %s912_s3, %s492_s7 }
  0x24   : > { %s226_s21 = scalar_lea.vmem [#allocation5], %s477_s6  ;;  %s223_s24 = scalar_lea.sflag [#allocation6], %s800_s5 }
  0x25   : > { %s236_s22 = sshll.u32 %s226_s21, 4  ;;  %s707_s10 = smov [#allocation5]   ;;  %s237_s22 = int_to_ptr.vmem [resolvable:$true] %s236_s22 }
  0x26   : > { %s605_s25 = scalar_lea.vmem %s237_s22, 128  ;;  %s610_s12 = sshll.u32 %s707_s10, 4  ;;  %s611_s12 = int_to_ptr.vmem [resolvable:$false] %s610_s12 }
  0x27   : > { %p606_p12 = scmp.ne.s32.totalorder %s237_s22, %s605_s25  ;;  %s612_s14 = scalar_lea.vmem %s611_s12, 256 }
  0x28   : > { %p613_p1 = scmp.lt.s32.totalorder %s237_s22, %s611_s12  ;;  %p614_p2 = scmp.lt.s32.totalorder %s612_s14, %s605_s25 }
  0x29   : > { %p608_p6 = pnand %p606_p12, %p566_p3 }
  0x2a   : > { %p615_p4 = por %p614_p2, %p613_p1 }
  0x2b   : > { %p609_p7 = pneg %p608_p6 }
  0x2d   : > { %p616_p10 = pnand %p615_p4, %p609_p7 }
  0x2f   : > { %619 = shalt.err (!%p616_p10)
}
  0x30   : > { %507 = dma.hbm_to_vmem [thread:$0]  (!%p809_p0), %s234_s11, 128, %s237_s22, %s223_s24  }
  0x31   : > { %245 = sbr.rel (%p827_p5) target bundleno = 210 (0xd2), region = 36  ;;  %s843_s5 = sand.u32 (!%p827_p5), 1, %s688_s16  }
  0x32   : > { %s846_s6 = sshll.u32 (!%p827_p5), %s843_s5, 3  ;;  %s248_s7 = scalar_lea.sflag (!%p827_p5), [#allocation3], %s843_s5 }
  0x33   : > { %s251_s8 = scalar_lea.vmem (!%p827_p5), [#allocation2], %s846_s6 }
  0x36   : > { %671 = dma.done.wait (%p782_p8), %s248_s7, 128  }
  0x37   : > { %673 = vsyncadd (%p782_p8), %s248_s7, 4294967168  ;;  %s257_s13 = scalar_lea.sflag [#allocation6], %s843_s5  ;;  %s260_s26 = scalar_lea.vmem [#allocation5], %s846_s6 }
  0x38   : > { %675 = dma.done.wait (%p782_p8), %s257_s13, 128  }
  0x39   : > { %677 = vsyncadd (%p782_p8), %s257_s13, 4294967168  ;;  %p296_p0 = scmp.lt.s32.totalorder %s696_s18, 1  ;;  %v708_v0 = vmov 0   ;;  %v310_v3 = vlaneseq  ;;  %v302_v8 = vld [vmem:[%s251_s8] sm:$0xff]  ;;  %v303_v10 = vld [vmem:[%s260_s26] sm:$0xff]  ;;  %s494_s27 = sshll.u32 %s696_s18, 7 }
  0x3a   : > { %563 = vset.pattern.permute.xlu0 %v708_v0  ;;  %s295_s12 = scalar_lea.vmem [#allocation7], %s846_s6  ;;  %s329_s11 = scalar_lea.sflag [#allocation4], %s843_s5 }
  0x3b   : > { %s297_s9 = scalar_select %p296_p0, %s696_s18, 1  ;;  %v311_v4 = vshrl.u32 %v310_v3, 7 }
  0x3c   : > { %s345_s14 = sshll.u32 %s295_s12, 4  ;;  %s709_s8 = smov [#allocation7]   ;;  %s346_s14 = int_to_ptr.vmem [resolvable:$true] %s345_s14 }
  0x3d   : > { %s298_s22 = scalar_lea.vmem %s909_s0, %s297_s9  ;;  %s301_s10 = scalar_lea.vmem %s910_s1, %s297_s9  ;;  %v312_v5 = vsub.s32 0, %v311_v4 }
  0x3e   : > { %v304_v1 = vld [vmem:[%s298_s22] sm:$0x1]  ;;  %s343_s9 = scalar_lea.hbm %s913_s4, %s494_s27  ;;  %s620_s21 = scalar_lea.vmem %s346_s14, 128 }
  0x3f   : > { %307 = vperm.xlu0 %563, %v304_v1   ;;  %v315_v2 = vld [vmem:[%s301_s10] sm:$0x1]  ;;  %p621_p8 = scmp.ne.s32.totalorder %s346_s14, %s620_s21  ;;  %s624_s26 = sshll.u32 %s709_s8, 4  ;;  %s625_s26 = int_to_ptr.vmem [resolvable:$false] %s624_s26 }
  0x40   : > { %s626_s18 = scalar_lea.vmem %s625_s26, 256  ;;  %p627_p5 = scmp.lt.s32.totalorder %s346_s14, %s625_s26 }
  0x41   : > { %p622_p3 = pnand %p621_p8, %p786_p9  ;;  %p628_p12 = scmp.lt.s32.totalorder %s626_s18, %s620_s21 }
  0x43   : > { %318 = vperm.xlu0 %563, %v315_v2   ;;  %p623_p13 = pneg %p622_p3  ;;  %p629_p6 = por %p628_p12, %p627_p5 }
  0x45   : > { %p630_p7 = pnand %p629_p6, %p623_p13 }
  0xba   : > { %v308_v6 = vpop.permute.xlu0 %307 }
  0xbb   : > { %v313_v7 = vrot.slane %v308_v6, %v312_v5 }
  0xbd   : > { %v314_v12 = vmul.f32 %v313_v7, %v302_v8 }
  0xbe   : > { %v319_v9 = vpop.permute.xlu0 %318 }
  0xbf   : > { %v324_v11 = vrot.slane %v319_v9, %v312_v5 }
  0xc1   : > { %v325_v13 = vmul.f32 %v324_v11, %v303_v10 }
  0xc3   : > { %v326_v14 = vadd.f32 %v325_v13, %v314_v12 }
  0xc5   : > { %327 = vst [vmem:[%s295_s12] sm:$0xff] %v326_v14 }
  0xc6   : > { %633 = shalt.err (!%p630_p7)
}
  0xc7   : > { %s634_s6 = scalar_lea.hbm %s343_s9, 128  ;;  %s638_s24 = scalar_lea.hbm %s913_s4, 256 }
  0xc8   : > { %p635_p1 = scmp.ne.s32.totalorder %s343_s9, %s634_s6  ;;  %p639_p10 = scmp.lt.s32.totalorder %s343_s9, %s913_s4 }
  0xc9   : > { %p640_p0 = scmp.lt.s32.totalorder %s638_s24, %s634_s6 }
  0xca   : > { %p636_p2 = pnand %p635_p1, %p786_p9 }
  0xcb   : > { %p641_p8 = por %p640_p0, %p639_p10 }
  0xcc   : > { %p637_p4 = pneg %p636_p2 }
  0xce   : > { %p642_p3 = pnand %p641_p8, %p637_p4 }
  0xd0   : > { %645 = shalt.err (!%p642_p3)
}
  0xd1   : > { %499 = dma.vmem_to_hbm [thread:$0]  (%p786_p9), %s346_s14, 128, %s343_s9, %s329_s11  }
  0xd2 PF: > { %s357_s27 = sand.u32 1, %s684_s15   ;;  %p920_p13 = scmp.ge.s32.totalorder %s704_s20, 2 }
  0xd3   : > { %s358_s12 = scalar_lea.sflag [#allocation4], %s357_s27 }
  0xd4   : > { %p509_p5 = pnand %p920_p13, %p793_p11 }
  0xd6   : > { %p510_p12 = pneg %p509_p5 }
  0xd8   : > { %679 = dma.done.wait (%p510_p12), %s358_s12, 128  }
  0xd9   : > { %681 = vsyncadd (%p510_p12), %s358_s12, 4294967168  ;;  %s23_s20 = sadd.s32 1, %s704_s20   ;;  %s921_s15 = smov %s688_s16 }
  0xda   : > { %p20_p6 = scmp.ge.s32.totalorder %s23_s20, 4   ;;  %s922_s16 = smov %s692_s17 }
  0xdb   : > { %s923_s17 = smov %s791_s29  ;;  %s924_s18 = smov %s700_s19 }
  0xdc   : > { %s925_s19 = smov %s927_s23  ;;  %22 = sbr.rel (!%p20_p6) target bundleno = 8 (0x8), region = 100 }
  0xe1   :  { %363 = vsyncpa [#allocation3], 1 }
  0xe2   :  { %365 = vsyncpa [#allocation3 + $0x1], 1 }
  0xe3   :  { %366 = vsyncpa [#allocation6], 1 }
  0xe4   :  { %368 = vsyncpa [#allocation6 + $0x1], 1 }
  0xe5   :  { %369 = vsyncpa [#allocation4], 1 }
  0xe6   :  { %371 = vsyncpa [#allocation4 + $0x1], 1 }

</bundles_post_ra>
